<compile_context>
chip_gen: v7x
topology: tpu7x:2x2x1
jax: 0.10.0
libtpu: 0.0.40
codegen_flags: <defaults>
</compile_context>

<pallas_src>
import functools

import jax
import jax.numpy as jnp
from jax import lax
from jax.experimental import pallas as pl
from jax.experimental.pallas import tpu as pltpu


# ---------------------------------------------------------------------------
# Kernel 1: wavelength MLP  (Linear(1,128) -> ReLU -> Linear(128,D) -> LayerNorm)
# ---------------------------------------------------------------------------
def mlp_kernel(wl_ref, w1_ref, b1_ref, w2_ref, b2_ref, g_ref, beta_ref, o_ref):
    wl = wl_ref[...]                                       # (NW, 1)
    # Linear(1, 128): K=1 matmul == broadcasted multiply
    h = jnp.maximum(wl * w1_ref[...] + b1_ref[...], 0.0)   # (NW, 128)
    # Linear(128, D) on the MXU
    y = jnp.dot(h, w2_ref[...], preferred_element_type=jnp.float32) + b2_ref[...]
    # LayerNorm over last dim (biased variance, eps=1e-5), like nn.LayerNorm
    mean = jnp.mean(y, axis=-1, keepdims=True)
    var = jnp.mean(jnp.square(y - mean), axis=-1, keepdims=True)
    o_ref[...] = (y - mean) * lax.rsqrt(var + 1e-5) * g_ref[...] + beta_ref[...]


# ---------------------------------------------------------------------------
# Kernel 2: adaptive conv2d as a single im2col MXU matmul per batch element
# ---------------------------------------------------------------------------
def conv_kernel(w_ref, b_ref, x_ref, o_ref, xf_ref, p_ref, *,
                C, H, W, KH, KW, PH, PW, Wp, Lout):
    # w_ref : VMEM (OC, KH*KW*C)    combined weights, K ordered (ky, kx, c)
    # b_ref : VMEM (OC, 1)          conv bias
    # x_ref : VMEM (1, C, H, W)     unpadded input block for this batch element
    # o_ref : VMEM (1, OC, Lout)    lane-dense stride-1 "full correlation" output
    # xf_ref: VMEM (C, Hp*Wp+KW-1)  zero-padded input, spatially flattened
    # p_ref : VMEM (KH*KW*C, Lout)  im2col patch matrix

    # (1) Build the zero-padded input in flat (Hp*Wp) layout.  Only the border
    #     needs zeros but zeroing the whole (tiny) scratch is simplest.
    xf_ref[...] = jnp.zeros_like(xf_ref)
    for r in range(H):
        dst = (PH + r) * Wp + PW
        xf_ref[:, dst:dst + W] = x_ref[0, :, r, :]

    # (2) im2col: in the flat layout, the (ky, kx) tap evaluated at every
    #     stride-1 flat position is the contiguous window
    #     xf[:, ky*Wp+kx : ky*Wp+kx+Lout]  of shape (C, Lout).
    for ky in range(KH):
        for kx in range(KW):
            k = ky * KW + kx
            s = ky * Wp + kx
            p_ref[k * C:(k + 1) * C, :] = xf_ref[:, s:s + Lout]

    # (3) All OC output planes at once on the MXU, f32 accumulate, lane-dense
    #     store.  Columns whose flat position wraps across an image row are
    #     junk and get dropped by the wrapper.
    o_ref[0] = (jnp.dot(w_ref[...], p_ref[...],
                        preferred_element_type=jnp.float32)
                + b_ref[...]).astype(o_ref.dtype)


# ---------------------------------------------------------------------------
# Wrapper
# ---------------------------------------------------------------------------
def adaptive_conv_block(x, wavelengths, params, *, out_channels, kernel_size,
                        stride=(1, 1), padding=(0, 0)):
    B, C, H, W = x.shape
    KH, KW = kernel_size
    SH, SW = stride
    PH, PW = padding
    OC = out_channels
    D = OC * KH * KW
    NW = wavelengths.shape[0]
    assert NW == C, "number of wavelengths must equal x's input channels"

    # ---- MLP on wavelengths (Pallas, single grid point) -------------------
    wl2 = wavelengths.reshape(NW, 1).astype(jnp.float32)
    mlp_out = pl.pallas_call(
        mlp_kernel,
        out_shape=jax.ShapeDtypeStruct((NW, D), jnp.float32),
    )(wl2, params["w1"], params["b1"], params["w2"], params["b2"],
      params["ln_g"], params["ln_b"])

    # Raw-buffer reinterpretation, same as torch .view(OC, -1, KH, KW)
    mapped = mlp_out.reshape(OC, NW, KH, KW)
    combined = params["conv_w"].reshape(OC, 1, KH, KW) * mapped     # (OC, C, KH, KW)
    # Reorder the contraction dim to (ky, kx, c) to match the im2col row order.
    w_mat = jnp.transpose(combined, (0, 2, 3, 1)).reshape(OC, KH * KW * C)
    w_mat = w_mat.astype(jnp.float32)
    bias = params["conv_b"].reshape(OC, 1).astype(jnp.float32)

    # ---- conv2d (Pallas) ---------------------------------------------------
    Hp, Wp = H + 2 * PH, W + 2 * PW
    OH = (Hp - KH) // SH + 1
    OW = (Wp - KW) // SW + 1
    OH1 = Hp - KH + 1            # stride-1 output height (full correlation)
    OW1 = Wp - KW + 1            # stride-1 output width
    Lout = OH1 * Wp              # lane-dense flat output width per channel

    kern = functools.partial(conv_kernel, C=C, H=H, W=W, KH=KH, KW=KW,
                             PH=PH, PW=PW, Wp=Wp, Lout=Lout)

    out_full = pl.pallas_call(
        kern,
        grid=(B,),
        in_specs=[
            pl.BlockSpec((OC, KH * KW * C), lambda b: (0, 0)),   # weights (VMEM)
            pl.BlockSpec((OC, 1), lambda b: (0, 0)),             # bias    (VMEM)
            pl.BlockSpec((1, C, H, W), lambda b: (b, 0, 0, 0)),  # x block
        ],
        out_specs=pl.BlockSpec((1, OC, Lout), lambda b: (b, 0, 0)),
        out_shape=jax.ShapeDtypeStruct((B, OC, Lout), jnp.float32),
        scratch_shapes=[
            pltpu.VMEM((C, Hp * Wp + KW - 1), jnp.float32),      # flat padded x
            pltpu.VMEM((KH * KW * C, Lout), jnp.float32),        # im2col patches
        ],
        compiler_params=pltpu.CompilerParams(
            dimension_semantics=("parallel",)),
    )(w_mat, bias, x.astype(jnp.float32))

    # Drop wrap-around junk columns and apply stride (tiny XLA glue).
    out = out_full.reshape(B, OC, OH1, Wp)[:, :, ::SH, ::SW][:, :, :OH, :OW]
    return out


# ---------------------------------------------------------------------------
# Pure-JAX reference (for validation)
# ---------------------------------------------------------------------------
def reference(x, wavelengths, params, *, out_channels, kernel_size, stride, padding):
    OC = out_channels
    KH, KW = kernel_size
    NW = wavelengths.shape[0]
    wl2 = wavelengths.reshape(NW, 1).astype(jnp.float32)
    h = jnp.maximum(wl2 @ params["w1"].reshape(1, 128) + params["b1"], 0.0)
    y = h @ params["w2"] + params["b2"]
    mean = jnp.mean(y, axis=-1, keepdims=True)
    var = jnp.mean(jnp.square(y - mean), axis=-1, keepdims=True)
    y = (y - mean) * lax.rsqrt(var + 1e-5) * params["ln_g"] + params["ln_b"]
    mapped = y.reshape(OC, NW, KH, KW)
    combined = params["conv_w"].reshape(OC, 1, KH, KW) * mapped
    out = lax.conv_general_dilated(
        x.astype(jnp.float32), combined,
        window_strides=stride,
        padding=[(padding[0], padding[0]), (padding[1], padding[1])],
        dimension_numbers=("NCHW", "OIHW", "NCHW"))
    return out + params["conv_b"].reshape(1, OC, 1, 1)


# ---------------------------------------------------------------------------
if __name__ == "__main__":
    B, C, H, W = 2, 4, 16, 16
    OC = 8
    KH, KW = 3, 3
    STRIDE = (1, 1)
    PADDING = (1, 1)
    D = OC * KH * KW

    key = jax.random.PRNGKey(0)
    ks = jax.random.split(key, 9)

    params = {
        "conv_w": jax.random.normal(ks[0], (OC, 1, KH, KW), jnp.float32) * 0.1,
        "conv_b": jax.random.normal(ks[1], (OC,), jnp.float32) * 0.1,
        "w1":     jax.random.normal(ks[2], (1, 128), jnp.float32) * 0.5,
        "b1":     jax.random.normal(ks[3], (1, 128), jnp.float32) * 0.1,
        "w2":     jax.random.normal(ks[4], (128, D), jnp.float32) * 0.1,
        "b2":     jax.random.normal(ks[5], (1, D), jnp.float32) * 0.1,
        "ln_g":   jnp.ones((1, D), jnp.float32),
        "ln_b":   jnp.zeros((1, D), jnp.float32),
    }

    x = jax.random.normal(ks[6], (B, C, H, W), jnp.float32)
    wavelengths = jax.random.uniform(ks[7], (C,), jnp.float32,
                                     minval=0.4, maxval=0.7)

    out = adaptive_conv_block(
        x, wavelengths, params,
        out_channels=OC, kernel_size=(KH, KW), stride=STRIDE, padding=PADDING)
    out = jax.block_until_ready(out)

    ref = reference(
        x, wavelengths, params,
        out_channels=OC, kernel_size=(KH, KW), stride=STRIDE, padding=PADDING)
    assert out.shape == (B, OC, H, W)
    assert jnp.allclose(out, ref, rtol=2e-3, atol=2e-3), (
        float(jnp.max(jnp.abs(out - ref))))

    print("KERNEL_OK")
</pallas_src>

<mosaic_0001>
module attributes {stable_mosaic.version = 11 : i64} {
  func.func @mlp_kernel(%arg0: memref<4x1xf32, #tpu.memory_space<vmem>>, %arg1: memref<1x128xf32, #tpu.memory_space<vmem>>, %arg2: memref<1x128xf32, #tpu.memory_space<vmem>>, %arg3: memref<128x72xf32, #tpu.memory_space<vmem>>, %arg4: memref<1x72xf32, #tpu.memory_space<vmem>>, %arg5: memref<1x72xf32, #tpu.memory_space<vmem>>, %arg6: memref<1x72xf32, #tpu.memory_space<vmem>>, %arg7: memref<4x72xf32, #tpu.memory_space<vmem>>) attributes {dimension_semantics = [], scalar_prefetch = 0 : i64, scratch_operands = 0 : i64, tpu.core_type = #tpu.core_type<tc>} {
    %c0 = arith.constant 0 : index
    %c0_0 = arith.constant 0 : index
    %0 = vector.load %arg0[%c0, %c0_0] : memref<4x1xf32, #tpu.memory_space<vmem>>, vector<4x1xf32>
    %c0_1 = arith.constant 0 : index
    %c0_2 = arith.constant 0 : index
    %1 = vector.load %arg1[%c0_1, %c0_2] : memref<1x128xf32, #tpu.memory_space<vmem>>, vector<1x128xf32>
    %2 = vector.broadcast %0 : vector<4x1xf32> to vector<4x128xf32>
    %3 = vector.broadcast %1 : vector<1x128xf32> to vector<4x128xf32>
    %4 = arith.mulf %2, %3 : vector<4x128xf32>
    %c0_3 = arith.constant 0 : index
    %c0_4 = arith.constant 0 : index
    %5 = vector.load %arg2[%c0_3, %c0_4] : memref<1x128xf32, #tpu.memory_space<vmem>>, vector<1x128xf32>
    %6 = vector.broadcast %5 : vector<1x128xf32> to vector<4x128xf32>
    %7 = arith.addf %4, %6 : vector<4x128xf32>
    %cst = arith.constant 0.000000e+00 : f32
    %8 = vector.broadcast %cst : f32 to vector<4x128xf32>
    %9 = arith.maximumf %7, %8 : vector<4x128xf32>
    %c0_5 = arith.constant 0 : index
    %c0_6 = arith.constant 0 : index
    %10 = vector.load %arg3[%c0_5, %c0_6] : memref<128x72xf32, #tpu.memory_space<vmem>>, vector<128x72xf32>
    %cst_7 = arith.constant dense<0.000000e+00> : vector<4x72xf32>
    %11 = tpu.matmul %9, %10, %cst_7 {dimension_numbers = #tpu.dot_dimension_numbers<[1], [0], [0], [1], [0, 0, 1, 1], [], []>} : vector<4x128xf32>, vector<128x72xf32>, vector<4x72xf32> -> vector<4x72xf32>
    %c0_8 = arith.constant 0 : index
    %c0_9 = arith.constant 0 : index
    %12 = vector.load %arg4[%c0_8, %c0_9] : memref<1x72xf32, #tpu.memory_space<vmem>>, vector<1x72xf32>
    %13 = vector.broadcast %12 : vector<1x72xf32> to vector<4x72xf32>
    %14 = arith.addf %11, %13 : vector<4x72xf32>
    %cst_10 = arith.constant dense<0.000000e+00> : vector<4xf32>
    %15 = vector.multi_reduction <add>, %14, %cst_10 [1] : vector<4x72xf32> to vector<4xf32>
    %16 = vector.shape_cast %15 : vector<4xf32> to vector<4x1xf32>
    %cst_11 = arith.constant 7.200000e+01 : f32
    %17 = vector.broadcast %cst_11 : f32 to vector<4x1xf32>
    %18 = arith.divf %16, %17 : vector<4x1xf32>
    %19 = vector.broadcast %18 : vector<4x1xf32> to vector<4x72xf32>
    %20 = arith.subf %14, %19 : vector<4x72xf32>
    %21 = arith.mulf %20, %20 : vector<4x72xf32>
    %cst_12 = arith.constant dense<0.000000e+00> : vector<4xf32>
    %22 = vector.multi_reduction <add>, %21, %cst_12 [1] : vector<4x72xf32> to vector<4xf32>
    %23 = vector.shape_cast %22 : vector<4xf32> to vector<4x1xf32>
    %cst_13 = arith.constant 7.200000e+01 : f32
    %24 = vector.broadcast %cst_13 : f32 to vector<4x1xf32>
    %25 = arith.divf %23, %24 : vector<4x1xf32>
    %26 = vector.broadcast %18 : vector<4x1xf32> to vector<4x72xf32>
    %27 = arith.subf %14, %26 : vector<4x72xf32>
    %cst_14 = arith.constant 9.99999974E-6 : f32
    %28 = vector.broadcast %cst_14 : f32 to vector<4x1xf32>
    %29 = arith.addf %25, %28 : vector<4x1xf32>
    %30 = math.rsqrt %29 : vector<4x1xf32>
    %31 = vector.broadcast %30 : vector<4x1xf32> to vector<4x72xf32>
    %32 = arith.mulf %27, %31 : vector<4x72xf32>
    %c0_15 = arith.constant 0 : index
    %c0_16 = arith.constant 0 : index
    %33 = vector.load %arg5[%c0_15, %c0_16] : memref<1x72xf32, #tpu.memory_space<vmem>>, vector<1x72xf32>
    %34 = vector.broadcast %33 : vector<1x72xf32> to vector<4x72xf32>
    %35 = arith.mulf %32, %34 : vector<4x72xf32>
    %c0_17 = arith.constant 0 : index
    %c0_18 = arith.constant 0 : index
    %36 = vector.load %arg6[%c0_17, %c0_18] : memref<1x72xf32, #tpu.memory_space<vmem>>, vector<1x72xf32>
    %37 = vector.broadcast %36 : vector<1x72xf32> to vector<4x72xf32>
    %38 = arith.addf %35, %37 : vector<4x72xf32>
    %c0_19 = arith.constant 0 : index
    %c0_20 = arith.constant 0 : index
    %39 = vector.load %arg7[%c0_19, %c0_20] : memref<4x72xf32, #tpu.memory_space<vmem>>, vector<4x72xf32>
    tpu.vector_store %arg7[%c0_19, %c0_20], %38 {strides = array<i32>} : memref<4x72xf32, #tpu.memory_space<vmem>>, vector<4x72xf32>,
    return
  }
}

</mosaic_0001>

<bundles_post_ra>
// kernel: tpu_custom_call.1
= control target key start
LH: loop header
LB: loop body
LE: loop exit
PB: predicated region body
PF: predicated region fallthrough
CT: control target
= control target key end

     0   :  { %v302_v3 = vmov 0   ;;  %v303_v4 = vmov 0.0|0.0   ;;  %s428_s0 = inlined_call_operand.vmem [shape: f32[4,1], index: 0, kind: input, shape index: {}]   ;;  %s429_s1 = inlined_call_operand.vmem [shape: f32[1,128], index: 1, kind: input, shape index: {}]   ;;  %s430_s2 = inlined_call_operand.vmem [shape: f32[1,128], index: 2, kind: input, shape index: {}]   ;;  %s431_s3 = inlined_call_operand.vmem [shape: f32[128,72], index: 3, kind: input, shape index: {}]   ;;  %s432_s4 = inlined_call_operand.vmem [shape: f32[1,72], index: 4, kind: input, shape index: {}]   ;;  %s433_s5 = inlined_call_operand.vmem [shape: f32[1,72], index: 5, kind: input, shape index: {}]   ;;  %s434_s6 = inlined_call_operand.vmem [shape: f32[1,72], index: 6, kind: input, shape index: {}]   ;;  %s435_s7 = inlined_call_operand.hbm [shape: f32[4,72], index: 7, kind: output, shape index: {}]  }
   0x1   :  { %v27_v0 = vld [vmem:[%s428_s0] sm:$0xf]  ;;  %v51_v2 = vld [vmem:[%s431_s3 + $0x8] sm:$0xff]  ;;  %275 = vset.pattern.permute.xlu0 %v302_v3  ;;  %246 = vmatprep.subr.bf16.mxu0 %v303_v4  ;;  %v52_v6 = vld [vmem:[%s431_s3 + $0x10] sm:$0xff] }
   0x2   :  { %v50_v1 = vld [vmem:[%s431_s3] sm:$0xff]  ;;  %v53_v7 = vld [vmem:[%s431_s3 + $0x18] sm:$0xff]  ;;  %31 = vperm.xlu0 %275, %v27_v0   ;;  %v55_v10 = vld [vmem:[%s431_s3 + $0x28] sm:$0xff] }
   0x3   :  { %v247_v5 = vpack.c.bf16 %v51_v2, %v50_v1  ;;  %v250_v8 = vpack.c.bf16 %v53_v7, %v52_v6  ;;  %v54_v9 = vld [vmem:[%s431_s3 + $0x20] sm:$0xff] }
   0x5   :  { %248 = vmatpush3.bf16.msra.mxu0 %v247_v5 }
   0x6   :  { %249 = vmatprep.subr.bf16.mxu0 %v303_v4 }
   0x7   :  { %12 = vsyncpa [#allocation3], 0  ;;  %v253_v11 = vpack.c.bf16 %v55_v10, %v54_v9  ;;  %vm304_vm0 = vmmov 0   ;;  %v305_v12 = vmov 0.0   ;;  %v56_v13 = vld [vmem:[%s431_s3 + $0x30] sm:$0xff]  ;;  %v57_v14 = vld [vmem:[%s431_s3 + $0x38] sm:$0xff] }
   0x8   :  { %243 = vmatprep.mubr.msk.f32.mxu0 %vm304_vm0, %v305_v12  ;;  %v256_v15 = vpack.c.bf16 %v57_v14, %v56_v13  ;;  %v58_v16 = vld [vmem:[%s431_s3 + $0x40] sm:$0xff]  ;;  %v59_v17 = vld [vmem:[%s431_s3 + $0x48] sm:$0xff]  ;;  %v60_v19 = vld [vmem:[%s431_s3 + $0x50] sm:$0xff]  ;;  %vm143_vm1 = vcmask 584704   ;;  %s306_s16 = smov [#allocation2]  }
   0x9   :  { %251 = vmatpush3.bf16.msra.mxu0 %v250_v8  ;;  %v259_v18 = vpack.c.bf16 %v59_v17, %v58_v16  ;;  %v61_v20 = vld [vmem:[%s431_s3 + $0x58] sm:$0xff]  ;;  %v62_v22 = vld [vmem:[%s431_s3 + $0x60] sm:$0xff]  ;;  %v63_v23 = vld [vmem:[%s431_s3 + $0x68] sm:$0xff]  ;;  %s181_s17 = sshll.u32 %s306_s16, 4  ;;  %s182_s17 = int_to_ptr.vmem [resolvable:$true] %s181_s17 }
   0xa   :  { %252 = vmatprep.subr.bf16.mxu0 %v303_v4  ;;  %v262_v21 = vpack.c.bf16 %v61_v20, %v60_v19  ;;  %v265_v24 = vpack.c.bf16 %v63_v23, %v62_v22  ;;  %v64_v25 = vld [vmem:[%s431_s3 + $0x70] sm:$0xff]  ;;  %v65_v26 = vld [vmem:[%s431_s3 + $0x78] sm:$0xff]  ;;  %v189_v28 = vld [vmem:[%s429_s1] ss:$0 sm:$0xff]  ;;  %s278_s18 = scalar_lea.vmem %s182_s17, 64  ;;  %p283_p1 = scmp.lt.s32.totalorder %s182_s17, %s182_s17 }
   0xb   :  { %v268_v27 = vpack.c.bf16 %v65_v26, %v64_v25  ;;  %v190_v29 = vld [vmem:[%s430_s2] ss:$0 sm:$0xff]  ;;  %p279_p0 = scmp.ne.s32.totalorder %s182_s17, %s278_s18  ;;  %p284_p2 = scmp.lt.s32.totalorder %s278_s18, %s278_s18 }
   0xc   :  { %v191_v34 = vld [vmem:[%s432_s4] ss:$0 sm:$0xff] }
   0xd   :  { %254 = vmatpush3.bf16.msra.mxu0 %v253_v11  ;;  %v192_v48 = vld [vmem:[%s433_s5] ss:$0 sm:$0xff]  ;;  %p285_p3 = por %p284_p2, %p283_p1 }
   0xe   :  { %255 = vmatprep.subr.bf16.mxu0 %v303_v4  ;;  %v193_v50 = vld [vmem:[%s434_s6] ss:$0 sm:$0xff] }
   0xf   :  { %p286_p4 = pnand %p285_p3, %p279_p0 }
  0x11   :  { %257 = vmatpush3.bf16.msra.mxu0 %v256_v15 }
  0x12   :  { %258 = vmatprep.subr.bf16.mxu0 %v303_v4 }
  0x15   :  { %260 = vmatpush3.bf16.msra.mxu0 %v259_v18 }
  0x16   :  { %261 = vmatprep.subr.bf16.mxu0 %v303_v4 }
  0x19   :  { %263 = vmatpush3.bf16.msra.mxu0 %v262_v21 }
  0x1a   :  { %264 = vmatprep.subr.bf16.mxu0 %v303_v4 }
  0x1d   :  { %266 = vmatpush3.bf16.msra.mxu0 %v265_v24 }
  0x1e   :  { %267 = vmatprep.subr.bf16.mxu0 %v303_v4 }
  0x21   :  { %269 = vmatpush3.bf16.msra.mxu0 %v268_v27 }
  0x81   :  { %v32_v30 = vpop.permute.xlu0 %31 }
  0x82   :  { %v40_v31 = vmul.f32 %v189_v28, %v32_v30 }
  0x84   :  { %v48_v32 = vadd.f32 %v190_v29, %v40_v31 }
  0x86   :  { %v49_v33 = vmax.f32 %v48_v32, 0.0 }
  0x88   :  { %244 = vmatmul.mubr.f32.vlgmr.msra.gmra.mrb[0].mxu0 %v49_v33 }
 0x15b   :  { %v139_v35 = vpop.f32.mrb[0].mxu0 }
 0x15c   :  { %v140_v36 = vadd.f32 %v191_v34, %v139_v35  ;;  %v245_v37 = vpop.f32.mrb[1].mxu0 }
 0x15e   :  { %v144_v38 = vsel %vm143_vm1, %v140_v36, 0.0 }
 0x15f   :  { %145 = vadd.xlane.f32.xlu0 %v144_v38 }
 0x1ec   :  { %v146_v39 = vpop.xlane.xlu0 %145 }
 0x1ed   :  { %v148_v40 = vmul.f32 0.013888889, %v146_v39 }
 0x1ef   :  { %v149_v41 = vsub.f32 %v140_v36, %v148_v40 }
 0x1f1   :  { %v150_v42 = vmul.f32 %v149_v41, %v149_v41 }
 0x1f3   :  { %v151_v43 = vsel %vm143_vm1, %v150_v42, 0.0 }
 0x1f4   :  { %152 = vadd.xlane.f32.xlu1 %v151_v43 }
 0x281   :  { %v153_v44 = vpop.xlane.xlu1 %152 }
 0x282   :  { %v154_v45 = vmul.f32 0.013888889, %v153_v44 }
 0x284   :  { %v155_v46 = vadd.f32 1e-05, %v154_v45 }
 0x286   :  { %276 = vrsqrt.f32 %v155_v46 }
 0x290   :  { %v277_v47 = vpop.eup %276 }
 0x291   :  { %v157_v49 = vmul.f32 %v277_v47, %v149_v41 }
 0x293   :  { %v165_v51 = vmul.f32 %v192_v48, %v157_v49 }
 0x295   :  { %v173_v52 = vadd.f32 %v193_v50, %v165_v51 }
 0x297   :  { %174 = vst.msk [vmem:[#allocation2] sm:$0xf] %vm143_vm1, %v173_v52 }
 0x298   :  { %289 = shalt.err (!%p286_p4)
}
 0x299   :  { %s290_s20 = scalar_lea.hbm %s435_s7, 64 }
 0x29a   :  { %p291_p5 = scmp.ne.s32.totalorder %s435_s7, %s290_s20  ;;  %p294_p6 = scmp.lt.u32.totalorder %s290_s20, %s435_s7 }
 0x29c   :  { %p296_p7 = pnand %p294_p6, %p291_p5 }
 0x29e   :  { %299 = shalt.err (!%p296_p7)
}
 0x29f   :  { %184 = dma.vmem_to_hbm [thread:$0]  %s182_s17, 64, %s435_s7, [#allocation3]  }
 0x2a0   :  { %300 = dma.done.wait [#allocation3], 64  }
 0x2a1   :  { %301 = vsyncadd [#allocation3], 4294967232 }
 0x2a2   :  { %188 = vsyncpa [#allocation3], 1 }

</bundles_post_ra>
